<compile_context>
chip_gen: v5e
topology: v5e:2x2
jax: 0.10.0
libtpu: 0.0.40
codegen_flags: <defaults>
</compile_context>

<pallas_src>
import jax
import jax.numpy as jnp
from jax import lax
from jax.experimental import pallas as pl
from jax.experimental.pallas import tpu as pltpu


def _round_up(v, m):
    return (v + m - 1) // m * m


# ---------------------------------------------------------------------------
# Pass 1: streaming BN1 statistics — accumulate sum(x) and the Gram x^T x.
# Per-core partial accumulators (leading grid axis is "parallel").
# ---------------------------------------------------------------------------
def _stats_kernel(x_ref, sumx_ref, gram_ref):
    @pl.when(pl.program_id(1) == 0)
    def _init():
        sumx_ref[...] = jnp.zeros_like(sumx_ref)
        gram_ref[...] = jnp.zeros_like(gram_ref)

    tb, s, d = x_ref.shape
    x = x_ref[...].reshape(tb * s, d)          # free leading-dim merge for s % 8 == 0
    sumx_ref[...] += jnp.sum(x.astype(jnp.float32), axis=0,
                             keepdims=True).reshape(sumx_ref.shape)
    # x^T x on the MXU — transposed-LHS dot_general, contraction over rows.
    g = lax.dot_general(x, x, (((0,), (0,)), ((), ())),
                        preferred_element_type=jnp.float32)
    gram_ref[...] += g.reshape(gram_ref.shape)


# ---------------------------------------------------------------------------
# Pass 2: conv1 + BN1(affine) + ReLU + [sum(h1), Gram(h1)] + sign-folded conv2
#         + single extremum over s.
# ---------------------------------------------------------------------------
def _main_kernel(x_ref, w1_ref, w2s_ref, s1_ref, t1_ref,
                 ext_ref, sumh1_ref, gram1_ref):
    @pl.when(pl.program_id(1) == 0)
    def _init():
        sumh1_ref[...] = jnp.zeros_like(sumh1_ref)
        gram1_ref[...] = jnp.zeros_like(gram1_ref)

    tb, s, d = x_ref.shape
    c = w1_ref.shape[1]

    x = x_ref[...].reshape(tb * s, d)
    h1 = jnp.dot(x, w1_ref[...], preferred_element_type=jnp.float32)     # (tb*s, C)
    h1 = jnp.maximum(h1 * s1_ref[...] + t1_ref[...], 0.0)                # BN1 + ReLU

    # BN2 moments via MXU: sum(h1) and h1^T h1 (mean2/var2 derived in epilogue).
    sumh1_ref[...] += jnp.sum(h1, axis=0, keepdims=True).reshape(sumh1_ref.shape)
    h1c = h1.astype(w2s_ref.dtype)
    g1 = lax.dot_general(h1c, h1c, (((0,), (0,)), ((), ())),
                         preferred_element_type=jnp.float32)
    gram1_ref[...] += g1.reshape(gram1_ref.shape)

    # Sign-folded conv2: single extremum per channel (max of sign*h2) over s.
    h2s = jnp.dot(h1c, w2s_ref[...], preferred_element_type=jnp.float32)  # (tb*s, C)
    ext_ref[...] = jnp.max(h2s.reshape(tb, s, c), axis=1).astype(ext_ref.dtype)


# ---------------------------------------------------------------------------
# Tiling helpers.
# ---------------------------------------------------------------------------
def _legalize_tile(tb, B):
    """Largest tile <= tb that is a multiple of 8 and divides B (or B itself)."""
    tb = int(min(max(int(tb), 1), B))
    if tb >= B:
        return B
    tb = (tb // 8) * 8
    while tb >= 8 and B % tb:
        tb -= 8
    return tb if tb >= 8 else B


def _split_cores(steps_total):
    """2-way core split of the row axis when the step count allows it."""
    if steps_total >= 2 and steps_total % 2 == 0:
        return 2, steps_total // 2
    return 1, steps_total


def _vmem_budget():
    """Per-generation VMEM budget (v7x: 64 MiB/TC, v5e/v6e: 128 MiB)."""
    try:
        cap = int(getattr(pltpu.get_tpu_info(), "vmem_capacity_bytes",
                          64 * 1024 * 1024))
    except Exception:
        cap = 64 * 1024 * 1024
    if cap >= 96 * 1024 * 1024:          # v5e / v6e — use most of the 128 MiB
        return min(int(cap * 0.70), 100 * 1024 * 1024)
    return int(cap * 0.55)               # v7x — 64 MiB per TC, stay conservative


def _auto_tiles(B, s, d, C, itemsize, vmem_limit, row_tile, stats_row_tile):
    sp = _round_up(s, 8)
    dl = _round_up(d, 128)
    cl = _round_up(C, 128)
    if stats_row_tile is None:
        # Pass 1 only holds the (double-buffered, lane-padded) x tile.
        per_row = 2 * itemsize * sp * dl + 64
        stats_row_tile = (vmem_limit // 2) // max(per_row, 1)
    if row_tile is None:
        # Pass 2: x tile + f32 h1/h2s/gram temporaries.
        per_row = 2 * itemsize * sp * dl + 3 * 4 * s * cl
        row_tile = (vmem_limit // 2) // max(per_row, 1)
    return _legalize_tile(stats_row_tile, B), _legalize_tile(row_tile, B)


# ---------------------------------------------------------------------------
# Wrapper.
# ---------------------------------------------------------------------------
def local_op(x, w1, w2, gamma1, beta1, gamma2, beta2, *, eps=1e-5,
             row_tile=None, stats_row_tile=None):
    """x: (b, n, s, d).  Weights stored as (in_ch, out_ch).  Returns (b, C, n) f32."""
    b, n, s, d = x.shape
    C = w1.shape[1]
    B = b * n
    N = B * s                                  # BN sample count (batch * length)

    x3 = x.reshape(B, s, d)                    # free reshape (leading-axis merge)
    itemsize = jnp.dtype(x.dtype).itemsize

    w1f = w1.astype(jnp.float32)
    w2f = w2.astype(jnp.float32)
    g1f, b1f = gamma1.astype(jnp.float32), beta1.astype(jnp.float32)
    g2f, b2f = gamma2.astype(jnp.float32), beta2.astype(jnp.float32)

    # Sign-fold conv2's columns so only one extremum per channel is needed:
    # sign(scale2) == sign(gamma2) since rsqrt(var+eps) > 0.
    sign2 = jnp.where(g2f >= 0.0, 1.0, -1.0)                  # (C,)
    w1k = w1.astype(x.dtype)
    w2s = (w2f * sign2[None, :]).astype(x.dtype)

    vmem_limit = _vmem_budget()
    TB1, TB2 = _auto_tiles(B, s, d, C, itemsize, vmem_limit,
                           row_tile, stats_row_tile)
    steps1_total, steps2_total = B // TB1, B // TB2
    NC1, steps1 = _split_cores(steps1_total)
    NC2, steps2 = _split_cores(steps2_total)

    cparams = pltpu.CompilerParams(
        dimension_semantics=("parallel", "arbitrary"),
        vmem_limit_bytes=int(vmem_limit))

    # ------------------- pass 1: BN1 statistics (sum(x), x^T x) -------------
    sumx_p, gram_p = pl.pallas_call(
        _stats_kernel,
        grid=(NC1, steps1),
        in_specs=[pl.BlockSpec((TB1, s, d),
                               lambda c, i, S=steps1: (c * S + i, 0, 0))],
        out_specs=[pl.BlockSpec((1, 1, d), lambda c, i: (c, 0, 0)),
                   pl.BlockSpec((1, d, d), lambda c, i: (c, 0, 0))],
        out_shape=(jax.ShapeDtypeStruct((NC1, 1, d), jnp.float32),
                   jax.ShapeDtypeStruct((NC1, d, d), jnp.float32)),
        compiler_params=cparams,
        cost_estimate=pl.CostEstimate(
            flops=2 * N * d * d,
            transcendentals=0,
            bytes_accessed=N * d * itemsize + NC1 * (d * d + d) * 4),
    )(x3)

    # BN1 stats algebraically from sum(x) / Gram (h1 = x @ w1):
    #   mean1 = mean(x) @ w1 ;  E[h1^2]_c = w1_c^T (Gram/N) w1_c
    sumx = jnp.sum(sumx_p, axis=0)                           # (1, d)
    gram = jnp.sum(gram_p, axis=0)                           # (d, d)
    mean1 = (sumx / N @ w1f)[0]                              # (C,)
    e_h1sq = jnp.sum(w1f * (gram @ w1f), axis=0) / N         # (C,)
    var1 = jnp.maximum(e_h1sq - mean1 * mean1, 0.0)          # biased, clamped
    scale1 = g1f * lax.rsqrt(var1 + eps)
    shift1 = b1f - mean1 * scale1

    # ------------------- pass 2: fused main pass ----------------------------
    ext, sumh1_p, gram1_p = pl.pallas_call(
        _main_kernel,
        grid=(NC2, steps2),
        in_specs=[
            pl.BlockSpec((TB2, s, d), lambda c, i, S=steps2: (c * S + i, 0, 0)),
            pl.BlockSpec((d, C), lambda c, i: (0, 0)),
            pl.BlockSpec((C, C), lambda c, i: (0, 0)),
            pl.BlockSpec((1, C), lambda c, i: (0, 0)),
            pl.BlockSpec((1, C), lambda c, i: (0, 0)),
        ],
        out_specs=[
            pl.BlockSpec((TB2, C), lambda c, i, S=steps2: (c * S + i, 0)),
            pl.BlockSpec((1, 1, C), lambda c, i: (c, 0, 0)),
            pl.BlockSpec((1, C, C), lambda c, i: (c, 0, 0)),
        ],
        out_shape=(jax.ShapeDtypeStruct((B, C), jnp.float32),
                   jax.ShapeDtypeStruct((NC2, 1, C), jnp.float32),
                   jax.ShapeDtypeStruct((NC2, C, C), jnp.float32)),
        compiler_params=cparams,
        cost_estimate=pl.CostEstimate(
            flops=2 * N * C * d + 4 * N * C * C + 6 * N * C,
            transcendentals=0,
            bytes_accessed=(N * d + d * C + C * C) * itemsize
                           + (B * C + NC2 * (C * C + C) + 2 * C) * 4),
    )(x3, w1k, w2s, scale1.reshape(1, C), shift1.reshape(1, C))

    # ------------------- tiny (B, C) epilogue: BN2 + ReLU on the extremum ---
    sumh1 = jnp.sum(sumh1_p, axis=0)                         # (1, C)
    gram1 = jnp.sum(gram1_p, axis=0)                         # (C, C)
    mean2 = (sumh1 / N @ w2f)[0]                             # (C,)
    e_h2sq = jnp.sum(w2f * (gram1 @ w2f), axis=0) / N        # (C,)
    var2 = jnp.maximum(e_h2sq - mean2 * mean2, 0.0)
    scale2 = g2f * lax.rsqrt(var2 + eps)
    shift2 = b2f - mean2 * scale2
    # ext = max_s(sign*h2)  =>  scale2 * extremum-of-interest = |scale2| * ext.
    out = jnp.maximum(jnp.abs(scale2) * ext + shift2, 0.0)   # (B, C)

    # (B, C) -> (b, n, C) -> (b, C, n)
    return out.reshape(b, n, C).transpose(0, 2, 1)


def _reference(x, w1, w2, g1, b1, g2, b2, eps=1e-5):
    """Pure-JAX reference mirroring the PyTorch forward (training-mode BN)."""
    b, n, s, d = x.shape
    C = w1.shape[1]
    h = x.reshape(b * n * s, d) @ w1
    m = h.mean(0); v = ((h - m) ** 2).mean(0)
    h = jnp.maximum((h - m) / jnp.sqrt(v + eps) * g1 + b1, 0.0)
    h = h @ w2
    m = h.mean(0); v = ((h - m) ** 2).mean(0)
    h = jnp.maximum((h - m) / jnp.sqrt(v + eps) * g2 + b2, 0.0)
    h = h.reshape(b * n, s, C).max(axis=1)
    return h.reshape(b, n, C).transpose(0, 2, 1)


if __name__ == "__main__":
    # Small shapes consistent with the module: x is (b, n, s, d),
    # in_channels = d, out_channels = C.
    b, n, s, d = 2, 16, 16, 32
    C = 64

    key = jax.random.PRNGKey(0)
    kx, k1, k2 = jax.random.split(key, 3)

    x = jax.random.normal(kx, (b, n, s, d), dtype=jnp.float32)
    w1 = jax.random.normal(k1, (d, C), dtype=jnp.float32) * (1.0 / jnp.sqrt(d))
    w2 = jax.random.normal(k2, (C, C), dtype=jnp.float32) * (1.0 / jnp.sqrt(C))
    # BatchNorm1d default init: gamma = 1, beta = 0.
    gamma1 = jnp.ones((C,), jnp.float32); beta1 = jnp.zeros((C,), jnp.float32)
    gamma2 = jnp.ones((C,), jnp.float32); beta2 = jnp.zeros((C,), jnp.float32)

    ref = _reference(x, w1, w2, gamma1, beta1, gamma2, beta2)

    # Multi-tile path: B = 32, row_tile = 8 -> 4 steps -> 2 "cores" x 2 steps;
    # exercises per-core partial accumulators + per-tile extremum writeback.
    out = jax.block_until_ready(
        local_op(x, w1, w2, gamma1, beta1, gamma2, beta2,
                 row_tile=8, stats_row_tile=8))
    assert out.shape == (b, C, n), out.shape
    assert jnp.allclose(out, ref, atol=1e-4, rtol=1e-4), \
        float(jnp.max(jnp.abs(out - ref)))

    # Auto (VMEM-budgeted) tile path.
    out2 = jax.block_until_ready(
        local_op(x, w1, w2, gamma1, beta1, gamma2, beta2))
    assert jnp.allclose(out2, ref, atol=1e-4, rtol=1e-4), \
        float(jnp.max(jnp.abs(out2 - ref)))

    # Mixed-sign gamma2 exercises the sign-folded (min-via-max) path.
    gamma2n = jnp.where(jnp.arange(C) % 2 == 0, -0.5, 0.7).astype(jnp.float32)
    beta2n = 0.1 * jnp.ones((C,), jnp.float32)
    refn = _reference(x, w1, w2, gamma1, beta1, gamma2n, beta2n)
    outn = jax.block_until_ready(
        local_op(x, w1, w2, gamma1, beta1, gamma2n, beta2n,
                 row_tile=8, stats_row_tile=16))
    assert jnp.allclose(outn, refn, atol=1e-4, rtol=1e-4), \
        float(jnp.max(jnp.abs(outn - refn)))

    print("KERNEL_OK")
</pallas_src>

<mosaic_0001>
module attributes {stable_mosaic.version = 11 : i64} {
  func.func @_stats_kernel(%arg0: i32, %arg1: i32, %arg2: memref<8x16x32xf32, #tpu.memory_space<vmem>>, %arg3: memref<1x1x32xf32, #tpu.memory_space<vmem>>, %arg4: memref<1x32x32xf32, #tpu.memory_space<vmem>>) attributes {dimension_semantics = [#tpu.dimension_semantics<parallel>, #tpu.dimension_semantics<arbitrary>], iteration_bounds = array<i64: 2, 2>, scalar_prefetch = 0 : i64, scratch_operands = 0 : i64, tpu.core_type = #tpu.core_type<tc>, window_params = [{transform_indices = @transform_0, window_bounds = array<i64: 8, 16, 32>}, {transform_indices = @transform_1, window_bounds = array<i64: 1, 1, 32>}, {transform_indices = @transform_2, window_bounds = array<i64: 1, 32, 32>}]} {
    %c0_i32 = arith.constant 0 : i32
    %0 = arith.cmpi eq, %arg1, %c0_i32 : i32
    %1 = arith.extui %0 : i1 to i32
    %c0_i32_0 = arith.constant 0 : i32
    %2 = arith.cmpi ne, %1, %c0_i32_0 : i32
    scf.if %2 {
      %cst_16 = arith.constant 0.000000e+00 : f32
      %16 = vector.broadcast %cst_16 : f32 to vector<1x1x32xf32>
      %c0_17 = arith.constant 0 : index
      %c0_18 = arith.constant 0 : index
      %c0_19 = arith.constant 0 : index
      %17 = vector.load %arg3[%c0_17, %c0_18, %c0_19] : memref<1x1x32xf32, #tpu.memory_space<vmem>>, vector<1x1x32xf32>
      tpu.vector_store %arg3[%c0_17, %c0_18, %c0_19], %16 {strides = array<i32>} : memref<1x1x32xf32, #tpu.memory_space<vmem>>, vector<1x1x32xf32>,
      %cst_20 = arith.constant 0.000000e+00 : f32
      %18 = vector.broadcast %cst_20 : f32 to vector<1x32x32xf32>
      %c0_21 = arith.constant 0 : index
      %c0_22 = arith.constant 0 : index
      %c0_23 = arith.constant 0 : index
      %19 = vector.load %arg4[%c0_21, %c0_22, %c0_23] : memref<1x32x32xf32, #tpu.memory_space<vmem>>, vector<1x32x32xf32>
      tpu.vector_store %arg4[%c0_21, %c0_22, %c0_23], %18 {strides = array<i32>} : memref<1x32x32xf32, #tpu.memory_space<vmem>>, vector<1x32x32xf32>,
    } else {
    }
    %c0 = arith.constant 0 : index
    %c0_1 = arith.constant 0 : index
    %c0_2 = arith.constant 0 : index
    %3 = vector.load %arg2[%c0, %c0_1, %c0_2] : memref<8x16x32xf32, #tpu.memory_space<vmem>>, vector<8x16x32xf32>
    %4 = vector.shape_cast %3 : vector<8x16x32xf32> to vector<128x32xf32>
    %c0_3 = arith.constant 0 : index
    %c0_4 = arith.constant 0 : index
    %c0_5 = arith.constant 0 : index
    %5 = vector.load %arg3[%c0_3, %c0_4, %c0_5] : memref<1x1x32xf32, #tpu.memory_space<vmem>>, vector<1x1x32xf32>
    %cst = arith.constant dense<0.000000e+00> : vector<32xf32>
    %6 = vector.multi_reduction <add>, %4, %cst [0] : vector<128x32xf32> to vector<32xf32>
    %7 = vector.shape_cast %6 : vector<32xf32> to vector<1x32xf32>
    %8 = vector.shape_cast %7 : vector<1x32xf32> to vector<1x1x32xf32>
    %9 = arith.addf %5, %8 : vector<1x1x32xf32>
    %c0_6 = arith.constant 0 : index
    %c0_7 = arith.constant 0 : index
    %c0_8 = arith.constant 0 : index
    %10 = vector.load %arg3[%c0_6, %c0_7, %c0_8] : memref<1x1x32xf32, #tpu.memory_space<vmem>>, vector<1x1x32xf32>
    tpu.vector_store %arg3[%c0_6, %c0_7, %c0_8], %9 {strides = array<i32>} : memref<1x1x32xf32, #tpu.memory_space<vmem>>, vector<1x1x32xf32>,
    %cst_9 = arith.constant dense<0.000000e+00> : vector<32x32xf32>
    %11 = tpu.matmul %4, %4, %cst_9 {dimension_numbers = #tpu.dot_dimension_numbers<[0], [0], [1], [1], [0, 1, 1, 1], [], []>} : vector<128x32xf32>, vector<128x32xf32>, vector<32x32xf32> -> vector<32x32xf32>
    %c0_10 = arith.constant 0 : index
    %c0_11 = arith.constant 0 : index
    %c0_12 = arith.constant 0 : index
    %12 = vector.load %arg4[%c0_10, %c0_11, %c0_12] : memref<1x32x32xf32, #tpu.memory_space<vmem>>, vector<1x32x32xf32>
    %13 = vector.shape_cast %11 : vector<32x32xf32> to vector<1x32x32xf32>
    %14 = arith.addf %12, %13 : vector<1x32x32xf32>
    %c0_13 = arith.constant 0 : index
    %c0_14 = arith.constant 0 : index
    %c0_15 = arith.constant 0 : index
    %15 = vector.load %arg4[%c0_13, %c0_14, %c0_15] : memref<1x32x32xf32, #tpu.memory_space<vmem>>, vector<1x32x32xf32>
    tpu.vector_store %arg4[%c0_13, %c0_14, %c0_15], %14 {strides = array<i32>} : memref<1x32x32xf32, #tpu.memory_space<vmem>>, vector<1x32x32xf32>,
    return
  }
  func.func @transform_0(%arg0: i32, %arg1: i32) -> (i32, i32, i32) {
    %c2_i32 = arith.constant 2 : i32
    %0 = arith.muli %arg0, %c2_i32 : i32
    %1 = arith.addi %0, %arg1 : i32
    %c0_i32 = arith.constant 0 : i32
    %c0_i32_0 = arith.constant 0 : i32
    %c0_i32_1 = arith.constant 0 : i32
    return %1, %c0_i32, %c0_i32_0 : i32, i32, i32
  }
  func.func @transform_1(%arg0: i32, %arg1: i32) -> (i32, i32, i32) {
    %c0_i32 = arith.constant 0 : i32
    %c0_i32_0 = arith.constant 0 : i32
    %c0_i32_1 = arith.constant 0 : i32
    return %arg0, %c0_i32, %c0_i32_0 : i32, i32, i32
  }
  func.func @transform_2(%arg0: i32, %arg1: i32) -> (i32, i32, i32) {
    %c0_i32 = arith.constant 0 : i32
    %c0_i32_0 = arith.constant 0 : i32
    %c0_i32_1 = arith.constant 0 : i32
    return %arg0, %c0_i32, %c0_i32_0 : i32, i32, i32
  }
}

</mosaic_0001>

<bundles_post_ra>
// kernel: tpu_custom_call.1
= control target key start
LH: loop header
LB: loop body
LE: loop exit
PB: predicated region body
PF: predicated region fallthrough
CT: control target
= control target key end

     0   :  { %8 = vsyncpa [#allocation3], 0  ;;  %s1217_s0 = inlined_call_operand.hbm [shape: f32[32,16,32], index: 0, kind: input, shape index: {}]   ;;  %s1218_s1 = inlined_call_operand.hbm [shape: f32[2,1,32], index: 1, kind: output, shape index: {0}]   ;;  %s1219_s2 = inlined_call_operand.hbm [shape: f32[2,32,32], index: 2, kind: output, shape index: {1}]  }
   0x1   :  { %10 = vsyncpa [#allocation3 + $0x1], 0 }
   0x2   :  { %11 = vsyncpa [#allocation4], 0 }
   0x3   :  { %13 = vsyncpa [#allocation4 + $0x1], 0 }
   0x4   :  { %14 = vsyncpa [#allocation7], 0 }
   0x5   :  { %16 = vsyncpa [#allocation7 + $0x1], 0  ;;  %s874_s9 = smov 0   ;;  %s876_s10 = smov 0  }
   0x6   :  { %s878_s11 = smov 0   ;;  %s880_s12 = smov 0  }
   0x7   :  { %s882_s13 = smov 0   ;;  %s884_s14 = smov 0  }
   0x8   :  { %s886_s15 = smov 0   ;;  %s888_s16 = smov 0  }
   0x9   :  { %s890_s17 = smov 0   ;;  %s892_s18 = smov 0  }
   0xa   :  { %s894_s19 = smov 0  }
   0xb LB: > { %1223 = sst [smem:[#allocation11_spill]] %s848_s18  ;;  %s485_s20 = sadd.s32 4294967295, %s852_s19   ;;  %s852_s19 = sphi %s894_s19, %s22_s19   ;;  %s848_s18 = sphi %s892_s18, %s1232_s18   ;;  %s844_s17 = sphi %s890_s17, %s1240_s17   ;;  %s840_s16 = sphi %s888_s16, %s1230_s16   ;;  %s836_s15 = sphi %s886_s15, %s1239_s15   ;;  %s832_s14 = sphi %s884_s14, %s1238_s14   ;;  %s828_s13 = sphi %s882_s13, %s1237_s13   ;;  %s824_s12 = sphi %s880_s12, %s1236_s12   ;;  %s820_s11 = sphi %s878_s11, %s1235_s11   ;;  %s816_s10 = sphi %s876_s10, %s1234_s10   ;;  %s812_s9 = sphi %s874_s9, %s1233_s9  }
   0xc   : > { %s486_s21 = sadd.s32 4294967294, %s852_s19   ;;  %s31_s22 = sadd.s32 1, %s844_s17 }
   0xd   : > { %s34_s23 = sadd.s32 1, %s848_s18  ;;  %p32_p0 = scmp.ge.s32.totalorder %s31_s22, 2 }
   0xe   : > { %s487_s24 = sshll.u32 %s848_s18, 1  ;;  %s45_s26 = sadd.s32 1, %s832_s14 }
   0xf   : > { %s933_s25 = sadd.s32 %s844_s17, %s487_s24  ;;  %s1242_s22 = smov (%p32_p0, %s31_s22), 0 }
  0x10   : > { %1224 = sst [smem:[#allocation12_spill]] %s1242_s22  ;;  %s1244_s23 = smov (!%p32_p0, %s34_s23), %s848_s18 }
  0x11   : > { %p52_p1 = scmp.ne.s32.totalorder %s832_s14, %s828_s13  ;;  %p53_p2 = scmp.eq.s32.totalorder %s852_s19, 0 }
  0x12   : > { %p36_p3 = scmp.ge.s32.totalorder %s1244_s23, 2  ;;  %p58_p4 = scmp.ne.s32.totalorder %s828_s13, %s824_s12 }
  0x13   : > { %p943_p5 = por %p53_p2, %p52_p1  ;;  %p59_p6 = scmp.eq.s32.totalorder %s485_s20, 0 }
  0x14   : > { %s1246_s23 = smov (%p36_p3, %s1244_s23), 0  ;;  %s71_s29 = sadd.s32 1, %s820_s11 }
  0x15   : > { %1226 = sst [smem:[#allocation13_spill]] %s1246_s23  ;;  %p949_p7 = por %p59_p6, %p58_p4 }
  0x16   : > { %s488_s30 = sshll.u32 %s1246_s23, 1  ;;  %s68_s3 = ssub.s32 %s848_s18, %s1246_s23 }
  0x17   : > { %s41_s4 = sadd.s32 %s488_s30, %s1242_s22  ;;  %p69_p8 = scmp.eq.s32.totalorder %s68_s3, 0 }
  0x18   : > { %s42_s5 = ssub.s32 %s933_s25, %s41_s4  ;;  %p81_p9 = scmp.ne.s32.totalorder %s820_s11, %s816_s10 }
  0x19   : > { %p43_p10 = scmp.eq.s32.totalorder %s42_s5, 0  ;;  %p82_p11 = scmp.eq.s32.totalorder %s485_s20, 3 }
  0x1a   : > { %s962_s6 = scalar_select %p69_p8, %s820_s11, %s71_s29  }
  0x1b   : > { %s965_s7 = scalar_select %p43_p10, %s832_s14, %s45_s26  }
  0x1c   : > { %p967_p12 = por %p82_p11, %p81_p9  ;;  %p87_p13 = scmp.ne.s32.totalorder %s816_s10, %s812_s9 }
  0x1d   : > { %p88_p0 = scmp.eq.s32.totalorder %s486_s21, 3  ;;  %p573_p1 = scmp.lt.s32.totalorder %s852_s19, 4 }
  0x1e   : > { %s134_s12 = sand.u32 1, %s832_s14   ;;  %s506_s29 = sshll.u32 %s933_s25, 7 }
  0x1f   : > { %p977_p2 = por %p88_p0, %p87_p13  ;;  %s491_s20 = sshll.u32 %s134_s12, 7 }
  0x20   : > { %s146_s3 = scalar_lea.hbm %s1217_s0, %s506_s29  ;;  %s138_s5 = scalar_lea.vmem [#allocation2], %s491_s20 }
  0x21   : > { %s147_s4 = sshll.u32 %s146_s3, 4  ;;  %s149_s23 = sshll.u32 %s138_s5, 4  ;;  %s148_s4 = int_to_ptr.hbm [resolvable:$true] %s147_s4  ;;  %s150_s23 = int_to_ptr.vmem [resolvable:$true] %s149_s23 }
  0x22   : > { %p563_p3 = pnand %p573_p1, %p943_p5  ;;  %p496_p4 = scmp.ge.s32.totalorder %s852_s19, 1 }
  0x23   : > { %p157_p6 = scmp.lt.s32.totalorder %s852_s19, 5  ;;  %s135_s21 = scalar_lea.sflag [#allocation3], %s134_s12 }
  0x24   : > { %s854_s22 = smov 128   ;;  %s855_s18 = smov 8  }
  0x25   : > { %565 = dma.hbm_to_vmem [thread:$0]  (!%p563_p3), %s148_s4, 2048, %s150_s23, %s135_s21, %s854_s22, %s854_s22, %s855_s18  }
  0x26   : > { %p158_p8 = pnand %p496_p4, %p157_p6 }
  0x27   : > { %s163_s25 = sand.u32 (!%p158_p8), 1, %s828_s13  }
  0x28   : > { %161 = sbr.rel (%p158_p8) target bundleno = 387 (0x183), region = 24  ;;  %s497_s30 = sshll.u32 (!%p158_p8), %s163_s25, 7 }
  0x29   : > { %s164_s29 = scalar_lea.sflag (!%p158_p8), [#allocation3], %s163_s25  ;;  %s990_s26 = scalar_lea.vmem (!%p158_p8), [#allocation2], %s497_s30 }
  0x2d   : > { %799 = dma.done.wait (%p949_p7), %s164_s29, 2048  }
  0x2e   : > { %801 = vsyncadd (%p949_p7), %s164_s29, 4294965248  ;;  %s997_s27 = sand.u32 1, %s816_s10   ;;  %p499_p5 = scmp.ne.s32.totalorder %s836_s15, 0 }
  0x2f   : > { %s498_s18 = sshll.u32 %s997_s27, 5  ;;  %s1001_s22 = scalar_lea.vmem [#allocation5], %s997_s27 }
  0x30   : > { %s1003_s23 = scalar_lea.vmem [#allocation6], %s498_s18  ;;  %199 = sbr.rel (%p499_p5) target bundleno = 59 (0x3b), region = 32 }
  0x35   : > { %vm200_vm0 = vcmask 253952   ;;  %vm202_vm1 = vcmask 261120   ;;  %v856_v0 = vmov 0.0  }
  0x36   : > { %201 = vst.msk [vmem:[%s1001_s22] sm:$0x1] %vm200_vm0, %v856_v0 }
  0x37   : > { %203 = vst.msk [vmem:[%s1003_s23] sm:$0xff] %vm202_vm1, %v856_v0 }
  0x38   : > { %204 = vst.msk [vmem:[%s1003_s23 + $0x8] sm:$0xff] %vm202_vm1, %v856_v0 }
  0x39   : > { %205 = vst.msk [vmem:[%s1003_s23 + $0x10] sm:$0xff] %vm202_vm1, %v856_v0 }
  0x3a   : > { %206 = vst.msk [vmem:[%s1003_s23 + $0x18] sm:$0xff] %vm202_vm1, %v856_v0 }
  0x3b PF: > { %v1012_v1 = vld [vmem:[%s990_s26] sm:$0xff]  ;;  %vm224_vm2 = vcmask 261120   ;;  %v1016_v2 = vld [vmem:[%s990_s26 + $0x8] sm:$0xff]  ;;  %v1024_v6 = vld [vmem:[%s990_s26 + $0x10] sm:$0xff]  ;;  %s352_s12 = scalar_lea.hbm %s1218_s1, %s840_s16  ;;  %s354_s20 = sshll.u32 %s1001_s22, 4  ;;  %vm263_vm3 = vcmask 253952   ;;  %s355_s20 = int_to_ptr.vmem [resolvable:$true] %s354_s20 }
  0x3c   : > { %265 = vxpose.xlu0.b32.start [1/16] (narrow) %v1012_v1, 32  ;;  %v225_v3 = vsel %vm224_vm2, %v1012_v1, 0.0  ;;  %v226_v4 = vsel %vm224_vm2, %v1016_v2, 0.0  ;;  %v228_v7 = vsel %vm224_vm2, %v1024_v6, 0.0  ;;  %v1029_v9 = vld [vmem:[%s990_s26 + $0x18] sm:$0xff]  ;;  %v1035_v12 = vld [vmem:[%s990_s26 + $0x20] sm:$0xff] }
  0x3d   : > { %v227_v5 = vadd.f32 %v226_v4, %v225_v3  ;;  %v230_v10 = vsel %vm224_vm2, %v1029_v9, 0.0  ;;  %v232_v13 = vsel %vm224_vm2, %v1035_v12, 0.0  ;;  %v1040_v15 = vld [vmem:[%s990_s26 + $0x28] sm:$0xff]  ;;  %v1046_v18 = vld [vmem:[%s990_s26 + $0x30] sm:$0xff]  ;;  %v1051_v21 = vld [vmem:[%s990_s26 + $0x38] sm:$0xff]  ;;  %s356_s3 = sshll.u32 %s352_s12, 4  ;;  %s357_s3 = int_to_ptr.hbm [resolvable:$true] %s356_s3 }
  0x3e   : > { %v234_v16 = vsel %vm224_vm2, %v1040_v15, 0.0  ;;  %v236_v19 = vsel %vm224_vm2, %v1046_v18, 0.0  ;;  %v238_v22 = vsel %vm224_vm2, %v1051_v21, 0.0  ;;  %v1057_v24 = vld [vmem:[%s990_s26 + $0x40] sm:$0xff]  ;;  %v216_v27 = vld [vmem:[%s990_s26 + $0x48] sm:$0xff]  ;;  %v217_v30 = vld [vmem:[%s990_s26 + $0x50] sm:$0xff] }
  0x3f   : > { %v229_v8 = vadd.f32 %v228_v7, %v227_v5  ;;  %v240_v25 = vsel %vm224_vm2, %v1057_v24, 0.0  ;;  %v242_v28 = vsel %vm224_vm2, %v216_v27, 0.0  ;;  %v244_v31 = vsel %vm224_vm2, %v217_v30, 0.0  ;;  %v218_v33 = vld [vmem:[%s990_s26 + $0x58] sm:$0xff]  ;;  %v219_v36 = vld [vmem:[%s990_s26 + $0x60] sm:$0xff]  ;;  %v220_v39 = vld [vmem:[%s990_s26 + $0x68] sm:$0xff] }
  0x40   : > { %v246_v34 = vsel %vm224_vm2, %v218_v33, 0.0  ;;  %v248_v37 = vsel %vm224_vm2, %v219_v36, 0.0  ;;  %v250_v40 = vsel %vm224_vm2, %v220_v39, 0.0  ;;  %v1078_v42 = vld [vmem:[%s990_s26 + $0x78] sm:$0xff]  ;;  %v1083_v43 = vld [vmem:[%s990_s26 + $0x70] sm:$0xff]  ;;  %v326_v58 = vld [vmem:[%s1003_s23] sm:$0xff] }
  0x41   : > { %v231_v11 = vadd.f32 %v230_v10, %v229_v8  ;;  %297 = vmatpush.msra.mxu0 %v1078_v42  ;;  %508 = vmatpush.msra.mxu1 %v1078_v42  ;;  %v252_v48 = vsel %vm224_vm2, %v1083_v43, 0.0  ;;  %v254_v50 = vsel %vm224_vm2, %v1078_v42, 0.0  ;;  %v223_v59 = vld [vmem:[%s1001_s22] sm:$0x1]  ;;  %s339_s4 = scalar_lea.sflag [#allocation4], %s997_s27  ;;  %s712_s5 = sshra.s32 %s357_s3, 4  ;;  %s713_s5 = int_to_ptr.hbm [resolvable:$true] %s712_s5 }
  0x42   : > { %509 = vmatpush.msra.mxu2 %v1078_v42  ;;  %510 = vmatpush.msra.mxu3 %v1078_v42  ;;  %s714_s21 = scalar_lea.hbm %s713_s5, 1  ;;  %s718_s29 = scalar_lea.hbm %s1218_s1, 2 }
  0x43   : > { %v233_v14 = vadd.f32 %v232_v13, %v231_v11  ;;  %298 = vmatpush.msra.mxu0 %v1083_v43  ;;  %511 = vmatpush.msra.mxu1 %v1083_v43  ;;  %p715_p7 = scmp.ne.s32.totalorder %s713_s5, %s714_s21  ;;  %p719_p11 = scmp.lt.s32.totalorder %s713_s5, %s1218_s1 }
  0x44   : > { %266 = vxpose.xlu0.b32.cont [2/16] (narrow) %v1016_v2, 32  ;;  %512 = vmatpush.msra.mxu2 %v1083_v43  ;;  %p720_p13 = scmp.lt.s32.totalorder %s718_s29, %s714_s21 }
  0x45   : > { %v235_v17 = vadd.f32 %v234_v16, %v233_v14  ;;  %513 = vmatpush.msra.mxu3 %v1083_v43  ;;  %299 = vmatpush.msra.mxu0 %v220_v39  ;;  %p716_p9 = pnand %p715_p7, %p967_p12 }
  0x46   : > { %514 = vmatpush.msra.mxu1 %v220_v39  ;;  %515 = vmatpush.msra.mxu2 %v220_v39  ;;  %p721_p0 = por %p720_p13, %p719_p11 }
  0x47   : > { %v237_v20 = vadd.f32 %v236_v19, %v235_v17  ;;  %516 = vmatpush.msra.mxu3 %v220_v39  ;;  %300 = vmatpush.msra.mxu0 %v219_v36  ;;  %p717_p10 = pneg %p716_p9 }
  0x48   : > { %517 = vmatpush.msra.mxu1 %v219_v36  ;;  %518 = vmatpush.msra.mxu2 %v219_v36 }
  0x49   : > { %v239_v23 = vadd.f32 %v238_v22, %v237_v20  ;;  %301 = vmatpush.msra.mxu0 %v218_v33  ;;  %519 = vmatpush.msra.mxu3 %v219_v36  ;;  %p722_p1 = pnand %p721_p0, %p717_p10 }
  0x4a   : > { %520 = vmatpush.msra.mxu1 %v218_v33  ;;  %521 = vmatpush.msra.mxu2 %v218_v33 }
  0x4b   : > { %v241_v26 = vadd.f32 %v240_v25, %v239_v23  ;;  %302 = vmatpush.msra.mxu0 %v217_v30  ;;  %522 = vmatpush.msra.mxu3 %v218_v33 }
  0x4c   : > { %267 = vxpose.xlu0.b32.cont [3/16] (narrow) %v1024_v6, 32  ;;  %523 = vmatpush.msra.mxu1 %v217_v30 }
  0x4d   : > { %v243_v29 = vadd.f32 %v242_v28, %v241_v26  ;;  %524 = vmatpush.msra.mxu2 %v217_v30  ;;  %303 = vmatpush.msra.mxu0 %v216_v27 }
  0x4e   : > { %526 = vmatpush.msra.mxu1 %v216_v27  ;;  %525 = vmatpush.msra.mxu3 %v217_v30 }
  0x4f   : > { %v245_v32 = vadd.f32 %v244_v31, %v243_v29  ;;  %527 = vmatpush.msra.mxu2 %v216_v27  ;;  %304 = vmatpush.msra.mxu0 %v1057_v24 }
  0x50   : > { %529 = vmatpush.msra.mxu1 %v1057_v24  ;;  %528 = vmatpush.msra.mxu3 %v216_v27 }
  0x51   : > { %v247_v35 = vadd.f32 %v246_v34, %v245_v32  ;;  %530 = vmatpush.msra.mxu2 %v1057_v24  ;;  %305 = vmatpush.msra.mxu0 %v1051_v21 }
  0x52   : > { %532 = vmatpush.msra.mxu1 %v1051_v21  ;;  %531 = vmatpush.msra.mxu3 %v1057_v24 }
  0x53   : > { %v249_v38 = vadd.f32 %v248_v37, %v247_v35  ;;  %533 = vmatpush.msra.mxu2 %v1051_v21  ;;  %306 = vmatpush.msra.mxu0 %v1046_v18 }
  0x54   : > { %268 = vxpose.xlu0.b32.cont [4/16] (narrow) %v1029_v9, 32  ;;  %535 = vmatpush.msra.mxu1 %v1046_v18 }
  0x55   : > { %v1075_v41 = vadd.f32 %v250_v40, %v249_v38  ;;  %536 = vmatpush.msra.mxu2 %v1046_v18  ;;  %307 = vmatpush.msra.mxu0 %v1040_v15 }
  0x56   : > { %538 = vmatpush.msra.mxu1 %v1040_v15  ;;  %534 = vmatpush.msra.mxu3 %v1051_v21 }
  0x57   : > { %539 = vmatpush.msra.mxu2 %v1040_v15  ;;  %308 = vmatpush.msra.mxu0 %v1035_v12  ;;  %v253_v49 = vadd.f32 %v252_v48, %v1075_v41 }
  0x58   : > { %541 = vmatpush.msra.mxu1 %v1035_v12  ;;  %537 = vmatpush.msra.mxu3 %v1046_v18 }
  0x59   : > { %542 = vmatpush.msra.mxu2 %v1035_v12  ;;  %309 = vmatpush.msra.mxu0 %v1029_v9  ;;  %v255_v51 = vadd.f32 %v254_v50, %v253_v49 }
  0x5a   : > { %544 = vmatpush.msra.mxu1 %v1029_v9  ;;  %540 = vmatpush.msra.mxu3 %v1040_v15 }
  0x5b   : > { %545 = vmatpush.msra.mxu2 %v1029_v9  ;;  %310 = vmatpush.msra.mxu0 %v1024_v6  ;;  %v256_v52 = vrot.slane %v255_v51, 4 }
  0x5c   : > { %269 = vxpose.xlu0.b32.cont [5/16] (narrow) %v1035_v12, 32  ;;  %547 = vmatpush.msra.mxu1 %v1024_v6 }
  0x5d   : > { %548 = vmatpush.msra.mxu2 %v1024_v6  ;;  %311 = vmatpush.msra.mxu0 %v1016_v2  ;;  %v257_v53 = vadd.f32 %v256_v52, %v255_v51 }
  0x5e   : > { %550 = vmatpush.msra.mxu1 %v1016_v2  ;;  %543 = vmatpush.msra.mxu3 %v1035_v12 }
  0x5f   : > { %551 = vmatpush.msra.mxu2 %v1016_v2  ;;  %312 = vmatpush.msra.mxu0 %v1012_v1  ;;  %v258_v54 = vrot.slane %v257_v53, 2 }
  0x60   : > { %553 = vmatpush.msra.mxu1 %v1012_v1  ;;  %546 = vmatpush.msra.mxu3 %v1029_v9 }
  0x61   : > { %554 = vmatpush.msra.mxu2 %v1012_v1  ;;  %v259_v55 = vadd.f32 %v258_v54, %v257_v53 }
  0x62   : > { %549 = vmatpush.msra.mxu3 %v1024_v6 }
  0x63   : > { %v260_v56 = vrot.slane %v259_v55, 1 }
  0x64   : > { %270 = vxpose.xlu0.b32.cont [6/16] (narrow) %v1040_v15, 32  ;;  %552 = vmatpush.msra.mxu3 %v1016_v2 }
  0x65   : > { %v261_v57 = vadd.f32 %v260_v56, %v259_v55 }
  0x66   : > { %555 = vmatpush.msra.mxu3 %v1012_v1 }
  0x67   : > { %v262_v60 = vadd.f32 %v261_v57, %v223_v59 }
  0x69   : > { %264 = vst.msk [vmem:[%s1001_s22] sm:$0x1] %vm263_vm3, %v262_v60 }
  0x6c   : > { %271 = vxpose.xlu0.b32.cont [7/16] (narrow) %v1046_v18, 32 }
  0x74   : > { %272 = vxpose.xlu0.b32.cont [8/16] (narrow) %v1051_v21, 32 }
  0x7c   : > { %273 = vxpose.xlu0.b32.cont [9/16] (narrow) %v1057_v24, 32 }
  0x84   : > { %274 = vxpose.xlu0.b32.cont [10/16] (narrow) %v216_v27, 32 }
  0x8c   : > { %275 = vxpose.xlu0.b32.cont [11/16] (narrow) %v217_v30, 32 }
  0x94   : > { %276 = vxpose.xlu0.b32.cont [12/16] (narrow) %v218_v33, 32 }
  0x9c   : > { %277 = vxpose.xlu0.b32.cont [13/16] (narrow) %v219_v36, 32 }
  0xa4   : > { %278 = vxpose.xlu0.b32.cont [14/16] (narrow) %v220_v39, 32 }
  0xac   : > { %279 = vxpose.xlu0.b32.cont [15/16] (narrow) %v1083_v43, 32 }
  0xb4   : > { %280 = vxpose.xlu0.b32.end [16/16] (narrow) %v1078_v42, 32 }
  0xe0   : > { %v281_v44 = vpop.trf.xlu0 }
  0xe1   : > { %313 = vmatmul.f32.vlgmr.msra.gmra.mxu0 %v281_v44 }
  0xe8   : > { %v282_v45 = vpop.trf.xlu0 }
  0xe9   : > { %316 = vmatmul.f32.vlgmr.msra.gmra.mxu1 %v282_v45 }
  0xf0   : > { %v283_v46 = vpop.trf.xlu0 }
  0xf1   : > { %319 = vmatmul.f32.vlgmr.msra.gmra.mxu2 %v283_v46 }
  0xf8   : > { %v284_v47 = vpop.trf.xlu0 }
  0xf9   : > { %322 = vmatmul.f32.vlgmr.msra.gmra.mxu3 %v284_v47 }
 0x15e   : > { %v314_v61 = vpop.f32.mrf.mxu0 }
 0x15f   : > { %v330_v62 = vadd.f32 %v326_v58, %v314_v61 }
 0x160   : > { %725 = shalt.err (!%p722_p1)
}
 0x161   : > { %558 = dma.vmem_to_hbm [thread:$0]  (%p967_p12), %s355_s20, 16, %s357_s3, %s339_s4   ;;  %334 = vst.msk [vmem:[%s1003_s23] sm:$0xff] %vm224_vm2, %v330_v62  ;;  %v327_v63 = vld [vmem:[%s1003_s23 + $0x8] sm:$0xff]  ;;  %v328_v2 = vld [vmem:[%s1003_s23 + $0x10] sm:$0xff]  ;;  %v329_v5 = vld [vmem:[%s1003_s23 + $0x18] sm:$0xff] }
 0x162   : > { %s507_s22 = sshll.u32 %s840_s16, 5  ;;  %s368_s20 = sshll.u32 %s1003_s23, 4  ;;  %s369_s20 = int_to_ptr.vmem [resolvable:$true] %s368_s20 }
 0x163   : > { %s367_s12 = scalar_lea.hbm %s1219_s2, %s507_s22  ;;  %s343_s4 = scalar_lea.sflag [#allocation7], %s997_s27 }
 0x164   : > { %s370_s3 = sshll.u32 %s367_s12, 4  ;;  %s746_s30 = scalar_lea.hbm %s1219_s2, 64  ;;  %s371_s3 = int_to_ptr.hbm [resolvable:$true] %s370_s3 }
 0x165   : > { %s740_s16 = sshra.s32 %s371_s3, 4  ;;  %s741_s16 = int_to_ptr.hbm [resolvable:$true] %s740_s16 }
 0x166   : > { %v317_v0 = vpop.f32.mrf.mxu1  ;;  %s742_s5 = scalar_lea.hbm %s741_s16, 32  ;;  %p747_p8 = scmp.lt.s32.totalorder %s741_s16, %s1219_s2 }
 0x167   : > { %v331_v1 = vadd.f32 %v327_v63, %v317_v0  ;;  %p743_p3 = scmp.ne.s32.totalorder %s741_s16, %s742_s5  ;;  %p748_p5 = scmp.lt.s32.totalorder %s746_s30, %s742_s5 }
 0x169   : > { %335 = vst.msk [vmem:[%s1003_s23 + $0x8] sm:$0xff] %vm224_vm2, %v331_v1  ;;  %p744_p4 = pnand %p743_p3, %p967_p12  ;;  %p749_p7 = por %p748_p5, %p747_p8 }
 0x16b   : > { %p745_p6 = pneg %p744_p4 }
 0x16d   : > { %p750_p9 = pnand %p749_p7, %p745_p6 }
 0x174   : > { %v320_v3 = vpop.f32.mrf.mxu2 }
 0x175   : > { %v332_v4 = vadd.f32 %v328_v2, %v320_v3 }
 0x177   : > { %336 = vst.msk [vmem:[%s1003_s23 + $0x10] sm:$0xff] %vm224_vm2, %v332_v4 }
 0x17c   : > { %v323_v6 = vpop.f32.mrf.mxu3 }
 0x17d   : > { %v333_v7 = vadd.f32 %v329_v5, %v323_v6 }
 0x17f   : > { %337 = vst.msk [vmem:[%s1003_s23 + $0x18] sm:$0xff] %vm224_vm2, %v333_v7 }
 0x180   : > { %753 = shalt.err (!%p750_p9)
}
 0x181   : > { %s857_s27 = smov 128   ;;  %s858_s23 = smov 8  }
 0x182   : > { %559 = dma.vmem_to_hbm [thread:$0]  (%p967_p12), %s369_s20, 512, %s371_s3, %s343_s4, %s857_s27, %s857_s27, %s858_s23  }
 0x183 PF: > { %p574_p10 = scmp.ge.s32.totalorder %s852_s19, 2  ;;  %s385_s18 = sand.u32 1, %s812_s9  }
 0x184   : > { %s386_s22 = scalar_lea.sflag [#allocation4], %s385_s18 }
 0x185   : > { %p567_p11 = pnand %p574_p10, %p977_p2 }
 0x187   : > { %p568_p13 = pneg %p567_p11 }
 0x189   : > { %803 = dma.done.wait (%p568_p13), %s386_s22, 16  }
 0x18a   : > { %805 = vsyncadd (%p568_p13), %s386_s22, 4294967280  ;;  %s395_s15 = scalar_lea.sflag [#allocation7], %s385_s18 }
 0x18b   : > { %807 = dma.done.wait (%p568_p13), %s395_s15, 512  }
 0x18c   : > { %809 = vsyncadd (%p568_p13), %s395_s15, 4294966784  ;;  %s22_s19 = sadd.s32 1, %s852_s19   ;;  %s1230_s16 = sld [smem:[#allocation11_spill]] }
 0x18d   : > { %p19_p0 = scmp.ge.s32.totalorder %s22_s19, 6   ;;  %s1231_s8 = sld [smem:[#allocation12_spill]] }
 0x18e   : > { %s1232_s18 = sld [smem:[#allocation13_spill]]  ;;  %s1233_s9 = smov %s816_s10 }
 0x18f   : > { %s1234_s10 = smov %s820_s11  ;;  %s1235_s11 = smov %s962_s6 }
 0x190   : > { %s1236_s12 = smov %s828_s13  ;;  %s1237_s13 = smov %s832_s14 }
 0x191   : > { %s1238_s14 = smov %s965_s7  ;;  %s1239_s15 = smov %s844_s17 }
 0x192   :  { %21 = sbr.rel (!%p19_p0) target bundleno = 11 (0xb), region = 90 }
 0x193   : > { %s1240_s17 = smov %s1231_s8 }
 0x197   :  { %401 = vsyncpa [#allocation3], 1 }
 0x198   :  { %403 = vsyncpa [#allocation3 + $0x1], 1 }
 0x199   :  { %404 = vsyncpa [#allocation4], 1 }
 0x19a   :  { %406 = vsyncpa [#allocation4 + $0x1], 1 }
 0x19b   :  { %407 = vsyncpa [#allocation7], 1 }
 0x19c   :  { %409 = vsyncpa [#allocation7 + $0x1], 1 }

</bundles_post_ra>
